<compile_context>
chip_gen: v7x
topology: tpu7x:2x2x1
jax: 0.10.0
libtpu: 0.0.40
codegen_flags: <defaults>
</compile_context>

<pallas_src>
import math

import jax
import jax.numpy as jnp
from jax.experimental import pallas as pl
from jax.experimental.pallas import tpu as pltpu

_MIB = 1024 * 1024


def _round_up(x, m):
    return ((x + m - 1) // m) * m


def _vmem_capacity_bytes():
    """Physical VMEM per TensorCore; conservative fallback if query fails."""
    try:
        info = pltpu.get_tpu_info()
        cap = getattr(info, "vmem_capacity_bytes", None)
        if cap:
            return int(cap)
    except Exception:
        pass
    return 64 * _MIB  # v7x per-TC size: safe on all generations


def _pick_sublane_tile(dim, cap):
    """Largest multiple-of-8 tile <= cap that evenly divides `dim`."""
    cap = min(int(cap), dim)
    t = (cap // 8) * 8
    while t >= 8:
        if dim % t == 0:
            return t
        t -= 8
    return dim  # dim < 8: a full-extent block is always legal


def _pick_lane_tile(dim, cap):
    """Largest multiple-of-128 tile <= cap dividing `dim`, else full extent."""
    cap = min(int(cap), dim)
    t = (cap // 128) * 128
    while t >= 128:
        if dim % t == 0:
            return t
        t -= 128
    return dim  # dim < 128: full-extent block is always legal


# ---------------------------------------------------------------------------
# Stage 1: support = x @ weight  (cheap; weight resident, grid over row tiles)
# ---------------------------------------------------------------------------
def _xw_kernel(x_ref, w_ref, out_ref):
    out_ref[...] = jnp.dot(
        x_ref[...], w_ref[...], preferred_element_type=jnp.float32
    ).astype(out_ref.dtype)


def _xw_matmul(x, w, out_dtype, budget, vmem_cap):
    M, Kin = x.shape
    _, F = w.shape
    out_dtype = jnp.dtype(out_dtype)

    fixed = 2 * Kin * F * w.dtype.itemsize                       # resident weight
    per_row = 2 * Kin * x.dtype.itemsize + 2 * F * out_dtype.itemsize
    avail = max(budget - fixed, 8 * per_row)
    tm_cap = max(8, min(2048, avail // per_row))
    if M >= 16:                          # keep >= 2 row tiles (v7x megacore)
        tm_cap = min(tm_cap, M // 2)
    tm = _pick_sublane_tile(M, tm_cap)

    est = fixed + tm * per_row
    vmem_limit = int(min(0.9 * vmem_cap, max(32 * _MIB, est + 8 * _MIB)))

    return pl.pallas_call(
        _xw_kernel,
        out_shape=jax.ShapeDtypeStruct((M, F), out_dtype),
        grid_spec=pltpu.PrefetchScalarGridSpec(
            num_scalar_prefetch=0,
            grid=(M // tm,),
            in_specs=[
                pl.BlockSpec((tm, Kin), lambda i: (i, 0)),
                pl.BlockSpec((Kin, F), lambda i: (0, 0)),        # resident
            ],
            out_specs=pl.BlockSpec((tm, F), lambda i: (i, 0)),
        ),
        compiler_params=pltpu.CompilerParams(
            dimension_semantics=("parallel",),
            vmem_limit_bytes=vmem_limit,
        ),
    )(x, w)


# ---------------------------------------------------------------------------
# Stage 2 (dominant, HBM-bound): out = adj @ support + bias
# ---------------------------------------------------------------------------
def _make_agg_kernel(tk, compute_dtype, sup_resident):
    def kernel(adj_ref, sup_ref, bias_ref, out_ref):
        k = pl.program_id(1)
        # Cast the adj tile right before the MXU: adj is streamed once from HBM
        # in its stored dtype; no separate N^2 cast pass.
        a = adj_ref[...].astype(compute_dtype)
        if sup_resident:
            start = pl.multiple_of(k * tk, tk)
            b = sup_ref[pl.ds(start, tk), :]
        else:
            b = sup_ref[...]
        partial = jnp.dot(a, b, preferred_element_type=jnp.float32)

        # Output block is resident across the K axis -> accumulate in place.
        @pl.when(k == 0)
        def _():
            out_ref[...] = bias_ref[...] + partial

        @pl.when(k != 0)
        def _():
            out_ref[...] = out_ref[...] + partial

    return kernel


def _adj_aggregate(adj, support, bias2d, compute_dtype, budget, vmem_cap):
    M, K = adj.shape
    K2, F = support.shape
    assert K == K2
    compute_dtype = jnp.dtype(compute_dtype)

    sup_bytes = K * F * support.dtype.itemsize
    # Keep all of `support` resident in VMEM (DMA'd once) when it fits the
    # budget (2x for buffering); otherwise stream (tk, F) tiles per K step.
    sup_resident = 2 * sup_bytes <= budget // 2

    tk = _pick_lane_tile(K, 512)

    fixed = 2 * F * 4                                         # bias
    if sup_resident:
        fixed += 2 * sup_bytes
    else:
        fixed += 2 * tk * F * support.dtype.itemsize
    per_row = 2 * tk * adj.dtype.itemsize + 2 * F * 4         # adj + f32 out tiles
    avail = max(budget - fixed, 8 * per_row)
    tm_cap = max(8, min(2048, avail // per_row))
    if M >= 16:                          # keep >= 2 row tiles (v7x megacore)
        tm_cap = min(tm_cap, M // 2)
    tm = _pick_sublane_tile(M, tm_cap)

    grid = (M // tm, K // tk)

    if sup_resident:
        sup_spec = pl.BlockSpec((K, F), lambda i, k: (0, 0))  # loaded once
    else:
        sup_spec = pl.BlockSpec((tk, F), lambda i, k: (k, 0))

    est = fixed + tm * per_row
    vmem_limit = int(min(0.9 * vmem_cap, max(32 * _MIB, est + 8 * _MIB)))

    # TODO(synk): scalar-prefetch a per-row-tile list of nonzero adj column
    # blocks and skip all-zero blocks (structural sparsity, ~10x at 10% density).
    return pl.pallas_call(
        _make_agg_kernel(tk, compute_dtype, sup_resident),
        out_shape=jax.ShapeDtypeStruct((M, F), jnp.float32),
        grid_spec=pltpu.PrefetchScalarGridSpec(
            num_scalar_prefetch=0,
            grid=grid,
            in_specs=[
                pl.BlockSpec((tm, tk), lambda i, k: (i, k)),  # adj tile (stored dtype)
                sup_spec,
                pl.BlockSpec((1, F), lambda i, k: (0, 0)),    # bias (broadcast)
            ],
            out_specs=pl.BlockSpec((tm, F), lambda i, k: (i, 0)),  # resident over k
        ),
        compiler_params=pltpu.CompilerParams(
            dimension_semantics=("parallel", "arbitrary"),
            vmem_limit_bytes=vmem_limit,
        ),
    )(adj, support, bias2d)


# ---------------------------------------------------------------------------
# Public wrapper
# ---------------------------------------------------------------------------
def graph_convolution(x, adj, weight, bias=None, *, compute_dtype=jnp.bfloat16):
    """GCN forward: adj @ (x @ weight) + bias.

    `compute_dtype` is the MXU operand dtype of the aggregation matmul: adj
    tiles are cast to it in-kernel and support is stored in it.  Accumulation
    is always float32.  Note that with the default bfloat16 both adj and
    support are bf16-rounded; pass jnp.float32 for bit-faithful results.
    """
    N, in_f = x.shape
    in_f2, out_f = weight.shape
    assert in_f == in_f2 and adj.shape == (N, N)
    compute_dtype = jnp.dtype(compute_dtype)

    # Lane-dense output: pad out_f up to a multiple of 128, slice afterwards.
    out_f_pad = _round_up(out_f, 128)
    if out_f_pad != out_f:
        weight = jnp.pad(weight, ((0, 0), (0, out_f_pad - out_f)))
    if bias is None:
        bias2d = jnp.zeros((1, out_f_pad), jnp.float32)
    else:
        bias2d = jnp.pad(
            bias.astype(jnp.float32).reshape(1, out_f),
            ((0, 0), (0, out_f_pad - out_f)),
        )

    # Pad the node axis to a multiple of 128 so row tiles (mult of 8) and adj
    # column tiles (mult of 128) always divide evenly; padded rows/cols are
    # zeros and sliced off at the end.
    N_pad = _round_up(N, 128)
    if N_pad != N:
        x = jnp.pad(x, ((0, N_pad - N), (0, 0)))
        adj = jnp.pad(adj, ((0, N_pad - N), (0, N_pad - N)))

    # Keep stage-1 operand dtypes consistent (avoid mixed-dtype dot lowering).
    if x.dtype != weight.dtype:
        common = jnp.promote_types(x.dtype, weight.dtype)
        x = x.astype(common)
        weight = weight.astype(common)

    vmem_cap = _vmem_capacity_bytes()
    budget = int(0.75 * vmem_cap)

    # Stage 1 (cheap): support = x @ weight, emitted in compute_dtype so the
    # resident stage-2 operand is narrow.
    support = _xw_matmul(x, weight, compute_dtype, budget, vmem_cap)

    # Stage 2 (dominant): out = adj @ support + bias, f32 accumulation in the
    # resident output block; adj streamed once and cast per-tile in-kernel.
    out_pad = _adj_aggregate(adj, support, bias2d, compute_dtype, budget, vmem_cap)

    return out_pad[:N, :out_f]


if __name__ == "__main__":
    # Small, TPU-friendly shapes consistent with the module.
    N = 256            # number of graph nodes
    in_features = 128
    out_features = 128

    key = jax.random.PRNGKey(0)
    k_x, k_adj, k_w, k_b, k_x2, k_a2, k_w2 = jax.random.split(key, 7)

    # Deterministic parameter init, matching reset_parameters():
    # uniform(-stdv, stdv) with stdv = 1/sqrt(out_features)
    stdv = 1.0 / math.sqrt(out_features)
    weight = jax.random.uniform(
        k_w, (in_features, out_features), jnp.float32, minval=-stdv, maxval=stdv
    )
    bias = jax.random.uniform(
        k_b, (out_features,), jnp.float32, minval=-stdv, maxval=stdv
    )

    # Inputs: node features + a (dense representation of a) sparse adjacency.
    x = jax.random.normal(k_x, (N, in_features), jnp.float32)
    adj_dense = jax.random.uniform(k_adj, (N, N), jnp.float32)
    adj = jnp.where(adj_dense > 0.9, adj_dense, 0.0)  # ~10% sparse, stored dense

    # Plain-JAX reference.
    ref = adj @ (x @ weight) + bias[None, :]

    # Bit-faithful f32 path: must match the reference tightly.
    out_f32 = jax.block_until_ready(
        graph_convolution(x, adj, weight, bias, compute_dtype=jnp.float32)
    )
    assert out_f32.shape == (N, out_features)
    assert out_f32.dtype == jnp.float32
    assert jnp.allclose(out_f32, ref, atol=1e-3, rtol=1e-3)

    # Default (fast) bf16-operand path: f32 accumulation, looser tolerance
    # reflecting bf16 rounding of both adj and support operands.
    out_bf16 = jax.block_until_ready(graph_convolution(x, adj, weight, bias))
    assert out_bf16.shape == (N, out_features)
    assert out_bf16.dtype == jnp.float32
    assert jnp.allclose(out_bf16, ref, atol=0.15, rtol=0.05)

    # Non-aligned shapes (exercise N / out_f padding paths), no bias.
    N2, in_f2, out_f2 = 100, 64, 20
    x2 = jax.random.normal(k_x2, (N2, in_f2), jnp.float32)
    a2 = jax.random.uniform(k_a2, (N2, N2), jnp.float32)
    a2 = jnp.where(a2 > 0.9, a2, 0.0)
    w2 = jax.random.uniform(k_w2, (in_f2, out_f2), jnp.float32, minval=-0.2, maxval=0.2)
    ref2 = a2 @ (x2 @ w2)
    out2 = jax.block_until_ready(
        graph_convolution(x2, a2, w2, None, compute_dtype=jnp.float32)
    )
    assert out2.shape == (N2, out_f2)
    assert jnp.allclose(out2, ref2, atol=1e-3, rtol=1e-3)

    print("KERNEL_OK")
</pallas_src>

<mosaic_0001>
module attributes {stable_mosaic.version = 11 : i64} {
  func.func @_xw_kernel(%arg0: i32, %arg1: memref<128x128xf32, #tpu.memory_space<vmem>>, %arg2: memref<128x128xf32, #tpu.memory_space<vmem>>, %arg3: memref<128x128xf32, #tpu.memory_space<vmem>>) attributes {dimension_semantics = [#tpu.dimension_semantics<parallel>], iteration_bounds = array<i64: 2>, scalar_prefetch = 0 : i64, scratch_operands = 0 : i64, tpu.core_type = #tpu.core_type<tc>, window_params = [{transform_indices = @transform_0, window_bounds = array<i64: 128, 128>}, {pipeline_mode = #tpu.pipeline_mode<synchronous>, transform_indices = @transform_1, window_bounds = array<i64: 128, 128>}, {transform_indices = @transform_2, window_bounds = array<i64: 128, 128>}]} {
    %c0 = arith.constant 0 : index
    %c0_0 = arith.constant 0 : index
    %0 = vector.load %arg1[%c0, %c0_0] : memref<128x128xf32, #tpu.memory_space<vmem>>, vector<128x128xf32>
    %c0_1 = arith.constant 0 : index
    %c0_2 = arith.constant 0 : index
    %1 = vector.load %arg2[%c0_1, %c0_2] : memref<128x128xf32, #tpu.memory_space<vmem>>, vector<128x128xf32>
    %cst = arith.constant dense<0.000000e+00> : vector<128x128xf32>
    %2 = tpu.matmul %0, %1, %cst {dimension_numbers = #tpu.dot_dimension_numbers<[1], [0], [0], [1], [0, 0, 1, 1], [], []>} : vector<128x128xf32>, vector<128x128xf32>, vector<128x128xf32> -> vector<128x128xf32>
    %c0_3 = arith.constant 0 : index
    %c0_4 = arith.constant 0 : index
    %3 = vector.load %arg3[%c0_3, %c0_4] : memref<128x128xf32, #tpu.memory_space<vmem>>, vector<128x128xf32>
    tpu.vector_store %arg3[%c0_3, %c0_4], %2 {strides = array<i32>} : memref<128x128xf32, #tpu.memory_space<vmem>>, vector<128x128xf32>,
    return
  }
  func.func @transform_0(%arg0: i32) -> (i32, i32) {
    %c0_i32 = arith.constant 0 : i32
    %c0_i32_0 = arith.constant 0 : i32
    return %arg0, %c0_i32 : i32, i32
  }
  func.func @transform_1(%arg0: i32) -> (i32, i32) {
    %c0_i32 = arith.constant 0 : i32
    %c0_i32_0 = arith.constant 0 : i32
    %c0_i32_1 = arith.constant 0 : i32
    return %c0_i32, %c0_i32_0 : i32, i32
  }
  func.func @transform_2(%arg0: i32) -> (i32, i32) {
    %c0_i32 = arith.constant 0 : i32
    %c0_i32_0 = arith.constant 0 : i32
    return %arg0, %c0_i32 : i32, i32
  }
}

</mosaic_0001>

<bundles_post_ra>
// kernel: tpu_custom_call.1
= control target key start
LH: loop header
LB: loop body
LE: loop exit
PB: predicated region body
PF: predicated region fallthrough
CT: control target
= control target key end

     0   :  { %7 = vsyncpa [#allocation3], 0  ;;  %s1084_s0 = inlined_call_operand.hbm [shape: f32[256,128], index: 0, kind: input, shape index: {}]   ;;  %s1085_s1 = inlined_call_operand.hbm [shape: f32[128,128], index: 1, kind: input, shape index: {}]   ;;  %s1086_s2 = inlined_call_operand.hbm [shape: f32[256,128], index: 2, kind: output, shape index: {}]  }
   0x1   :  { %9 = vsyncpa [#allocation3 + $0x1], 0 }
   0x2   :  { %10 = vsyncpa [#allocation6], 0 }
   0x3   :  { %11 = vsyncpa [#allocation4], 0 }
   0x4   :  { %13 = vsyncpa [#allocation4 + $0x1], 0  ;;  %s836_s9 = smov 0   ;;  %s838_s10 = smov 0  }
   0x5   :  { %s840_s11 = smov 0   ;;  %s842_s12 = smov 0  }
   0x6 LB: > { %s857_s13 = sadd.s32 4294967295, %s812_s12   ;;  %s469_s14 = sadd.s32 4294967294, %s812_s12   ;;  %s812_s12 = sphi %s842_s12, %s1106_s12   ;;  %s808_s11 = sphi %s840_s11, %s1105_s11   ;;  %s804_s10 = sphi %s838_s10, %s1104_s10   ;;  %s800_s9 = sphi %s836_s9, %s1103_s9  }
   0x7   : > { %p39_p0 = scmp.ne.s32.totalorder %s804_s10, %s800_s9  ;;  %p1087_p1 = scmp.eq.s32.totalorder %s857_s13, 0 }
   0x8   : > { %p90_p3 = scmp.eq.s32.totalorder %s469_s14, 1  ;;  %p470_p5 = scmp.ge.s32.totalorder %s812_s12, 1 }
   0x9   : > { %p866_p4 = por %p1087_p1, %p39_p0  ;;  %p97_p7 = scmp.lt.s32.totalorder %s812_s12, 3 }
   0xa   : > { %p871_p6 = por %p90_p3, %p39_p0  ;;  %s814_s18 = smov [#allocation5]  }
   0xb   : > { %s1090_s15 = scalar_select %p866_p4, 1, 0 }
   0xc   : > { %s1091_s16 = scalar_select %p871_p6, 1, 0 }
   0xd   : > { %p876_p8 = pnand %p470_p5, %p97_p7  ;;  %s109_s19 = sshll.u32 %s814_s18, 4  ;;  %s880_s19 = int_to_ptr.vmem [resolvable:$true] %s109_s19 }
   0xe   : > { %s892_s21 = sadd.s32 1, %s812_s12   ;;  %s26_s22 = sadd.s32 1, %s808_s11 }
   0xf   : > { %s1092_s17 = scalar_select %p876_p8, 1, 0 }
  0x10   : > { %p631_p9 = pneg %p876_p8  ;;  %s23_s23 = ssub.s32 %s812_s12, %s892_s21 }
  0x11   : > { %s684_s26 = scalar_lea.hbm %s1085_s1, 2048 }
  0x12   : > { %p887_p11 = pnand %p631_p9, %p1087_p1  ;;  %p685_p12 = scmp.ne.s32.totalorder %s1085_s1, %s684_s26 }
  0x13   : > { %p691_p5 = scmp.lt.u32.totalorder %s684_s26, %s1085_s1 }
  0x14   : > { %p686_p13 = pneg %p887_p11 }
  0x16   : > { %p687_p0 = pnand %p686_p13, %p685_p12 }
  0x18   : > { %p688_p3 = pneg %p687_p0 }
  0x1a   : > { %p693_p7 = pnand %p691_p5, %p688_p3 }
  0x1c   : > { %696 = shalt.err (!%p693_p7)
}
  0x1d   : > { %s697_s3 = scalar_lea.vmem %s880_s19, 2048  ;;  %p705_p2 = scmp.lt.s32.totalorder %s880_s19, %s880_s19 }
  0x1e   : > { %p698_p9 = scmp.ne.s32.totalorder %s880_s19, %s697_s3  ;;  %p706_p6 = scmp.lt.s32.totalorder %s697_s3, %s697_s3 }
  0x20   : > { %p700_p10 = pnand %p698_p9, %p686_p13  ;;  %p707_p4 = por %p706_p6, %p705_p2 }
  0x22   : > { %p701_p1 = pneg %p700_p10 }
  0x24   : > { %p708_p8 = pnand %p707_p4, %p701_p1 }
  0x26   : > { %711 = shalt.err (!%p708_p8)
}
  0x27   : > { %s815_s4 = smov 128   ;;  %s816_s5 = smov 8  }
  0x28   : > { %634 = dma.hbm_to_vmem [thread:$0]  (!%p887_p11), %s1085_s1, 2048, %s880_s19, [#allocation6], %s815_s4, %s815_s4, %s816_s5  }
  0x29   : > { %p24_p1 = scmp.eq.s32.totalorder %s23_s23, 0  ;;  %p33_p2 = scmp.ne.s32.totalorder %s808_s11, %s804_s10 }
  0x2a   : > { %p34_p4 = scmp.eq.s32.totalorder %s812_s12, 0  ;;  %p644_p6 = scmp.lt.s32.totalorder %s812_s12, 2 }
  0x2b   : > { %s926_s8 = scalar_select %p24_p1, %s808_s11, %s26_s22  }
  0x2c   : > { %p35_p8 = por %p34_p4, %p33_p2  ;;  %p1094_p10 = scmp.eq.s32.totalorder %s857_s13, 1 }
  0x2d   : > { %s123_s18 = sand.u32 1, %s808_s11   ;;  %s485_s20 = sshll.u32 %s812_s12, 11 }
  0x2e   : > { %p930_p12 = por %p1094_p10, %p33_p2  ;;  %s473_s24 = sshll.u32 %s123_s18, 7 }
  0x2f   : > { %s939_s27 = scalar_lea.hbm %s1084_s0, %s485_s20  ;;  %s127_s19 = scalar_lea.vmem [#allocation2], %s473_s24 }
  0x30   : > { %s134_s22 = sshll.u32 %s127_s19, 4  ;;  %p941_p11 = pnand %p644_p6, %p35_p8  ;;  %s945_s22 = int_to_ptr.vmem [resolvable:$true] %s134_s22 }
  0x31   : > { %s947_s28 = scalar_lea.sflag [#allocation3], %s123_s18  ;;  %s712_s29 = scalar_lea.hbm %s939_s27, 2048 }
  0x32   : > { %p713_p13 = scmp.ne.s32.totalorder %s939_s27, %s712_s29  ;;  %p714_p0 = pneg %p941_p11 }
  0x33   : > { %s717_s6 = scalar_lea.hbm %s1084_s0, 4096  ;;  %p718_p7 = scmp.lt.u32.totalorder %s939_s27, %s1084_s0 }
  0x34   : > { %p715_p3 = pnand %p714_p0, %p713_p13  ;;  %p719_p9 = scmp.lt.u32.totalorder %s717_s6, %s712_s29 }
  0x35   : > { %p721_p2 = scmp.lt.u32.totalorder %s712_s29, %s939_s27 }
  0x36   : > { %p716_p5 = pneg %p715_p3  ;;  %p720_p1 = por %p719_p9, %p718_p7 }
  0x38   : > { %p722_p4 = por %p721_p2, %p720_p1 }
  0x3a   : > { %p723_p6 = pnand %p722_p4, %p716_p5 }
  0x3c   : > { %726 = shalt.err (!%p723_p6)
}
  0x3d   : > { %s727_s18 = scalar_lea.vmem %s945_s22, 2048  ;;  %s817_s24 = smov [#allocation2]  }
  0x3e   : > { %p728_p8 = scmp.ne.s32.totalorder %s945_s22, %s727_s18  ;;  %s732_s25 = sshll.u32 %s817_s24, 4  ;;  %s733_s25 = int_to_ptr.vmem [resolvable:$false] %s732_s25 }
  0x3f   : > { %s734_s26 = scalar_lea.vmem %s733_s25, 4096  ;;  %p735_p3 = scmp.lt.s32.totalorder %s945_s22, %s733_s25 }
  0x40   : > { %p730_p10 = pnand %p728_p8, %p714_p0  ;;  %p736_p7 = scmp.lt.s32.totalorder %s734_s26, %s727_s18 }
  0x42   : > { %p731_p13 = pneg %p730_p10  ;;  %p737_p9 = por %p736_p7, %p735_p3 }
  0x44   : > { %p738_p1 = pnand %p737_p9, %p731_p13 }
  0x46   : > { %741 = shalt.err (!%p738_p1)
}
  0x47   : > { %638 = dma.hbm_to_vmem [thread:$0]  (!%p941_p11), %s939_s27, 2048, %s945_s22, %s947_s28, %s815_s4, %s815_s4, %s816_s5  }
  0x48   : > { %p1097_p0 = scmp.ne.s32.totalorder %s1092_s17, 0 }
  0x49   : > { %s981_s19 = sand.u32 (!%p1097_p0), 1, %s804_s10   ;;  %p1098_p5 = scmp.ne.s32.totalorder (!%p1097_p0), %s1090_s15, 0 }
  0x4a   : > { %146 = sbr.rel (%p1097_p0) target bundleno = 360 (0x168), region = 28  ;;  %s477_s29 = sshll.u32 (!%p1097_p0), %s981_s19, 7 }
  0x4b   : > { %s149_s30 = scalar_lea.sflag (!%p1097_p0), [#allocation3], %s981_s19  ;;  %s987_s23 = scalar_lea.vmem (!%p1097_p0), [#allocation2], %s477_s29 }
  0x51   : > { %787 = dma.done.wait (%p1098_p5), %s149_s30, 2048  }
  0x52   : > { %789 = vsyncadd (%p1098_p5), %s149_s30, 4294965248  ;;  %p1099_p11 = scmp.eq.s32.totalorder %s857_s13, 0 }
  0x54   : > { %791 = dma.done.wait (%p1099_p11), [#allocation6], 2048   ;;  %p1100_p2 = pmov %p1099_p11 }
  0x55   : > { %v195_v0 = vld [vmem:[#allocation5] sm:$0xff]  ;;  %v196_v1 = vld [vmem:[#allocation5 + $0x8] sm:$0xff]  ;;  %v197_v2 = vld [vmem:[#allocation5 + $0x10] sm:$0xff]  ;;  %s1015_s15 = scalar_lea.vmem [#allocation7], %s477_s29  ;;  %s486_s17 = sshll.u32 %s857_s13, 11 }
  0x56   : > { %793 = vsyncadd (%p1100_p2), [#allocation6], 4294965248  ;;  %v575_v3 = vpack.c.bf16 %v196_v1, %v195_v0  ;;  %v198_v4 = vld [vmem:[#allocation5 + $0x18] sm:$0xff]  ;;  %v199_v6 = vld [vmem:[#allocation5 + $0x20] sm:$0xff]  ;;  %s386_s4 = sshll.u32 %s1015_s15, 4  ;;  %s1034_s22 = scalar_lea.hbm %s1086_s2, %s486_s17  ;;  %s1036_s4 = int_to_ptr.vmem [resolvable:$true] %s386_s4 }
  0x57   : > { %v579_v5 = vpack.c.bf16 %v198_v4, %v197_v2  ;;  %v200_v7 = vld [vmem:[#allocation5 + $0x28] sm:$0xff]  ;;  %v179_v9 = vld [vmem:[%s987_s23] sm:$0xff]  ;;  %v201_v11 = vld [vmem:[#allocation5 + $0x30] sm:$0xff]  ;;  %s373_s13 = scalar_lea.sflag [#allocation4], %s981_s19  ;;  %s742_s28 = scalar_lea.vmem %s1036_s4, 2048 }
  0x58   : > { %576 = vmatprep.subr.bf16.mxu0 %v575_v3  ;;  %607 = vmatprep.subr.bf16.mxu1 %v575_v3  ;;  %v583_v8 = vpack.c.bf16 %v200_v7, %v199_v6  ;;  %v187_v10 = vld [vmem:[%s987_s23 + $0x40] sm:$0xff]  ;;  %v202_v12 = vld [vmem:[#allocation5 + $0x38] sm:$0xff]  ;;  %v204_v15 = vld [vmem:[#allocation5 + $0x48] sm:$0xff]  ;;  %p743_p4 = scmp.ne.s32.totalorder %s1036_s4, %s742_s28  ;;  %s818_s3 = smov [#allocation7]  }
  0x59   : > { %578 = vmatpush3.bf16.msra.mxu0 %v575_v3  ;;  %615 = vmatpush3.bf16.msra.mxu1 %v575_v3  ;;  %v587_v13 = vpack.c.bf16 %v202_v12, %v201_v11  ;;  %v203_v14 = vld [vmem:[#allocation5 + $0x40] sm:$0xff]  ;;  %v205_v17 = vld [vmem:[#allocation5 + $0x50] sm:$0xff]  ;;  %v206_v18 = vld [vmem:[#allocation5 + $0x58] sm:$0xff]  ;;  %s746_s6 = sshll.u32 %s818_s3, 4  ;;  %s747_s6 = int_to_ptr.vmem [resolvable:$false] %s746_s6 }
  0x5a   : > { %580 = vmatprep.subr.bf16.mxu0 %v579_v5  ;;  %608 = vmatprep.subr.bf16.mxu1 %v579_v5  ;;  %v591_v16 = vpack.c.bf16 %v204_v15, %v203_v14  ;;  %v595_v19 = vpack.c.bf16 %v206_v18, %v205_v17  ;;  %v207_v20 = vld [vmem:[#allocation5 + $0x60] sm:$0xff]  ;;  %v208_v21 = vld [vmem:[#allocation5 + $0x68] sm:$0xff]  ;;  %v209_v23 = vld [vmem:[#allocation5 + $0x70] sm:$0xff]  ;;  %p744_p6 = pnand %p743_p4, %p930_p12  ;;  %s748_s7 = scalar_lea.vmem %s747_s6, 4096 }
  0x5b   : > { %551 = vmatprep.mubr.f32.mxu0 %v179_v9  ;;  %563 = vmatprep.mubr.f32.mxu1 %v187_v10  ;;  %v599_v22 = vpack.c.bf16 %v208_v21, %v207_v20  ;;  %v210_v24 = vld [vmem:[#allocation5 + $0x78] sm:$0xff]  ;;  %v180_v26 = vld [vmem:[%s987_s23 + $0x8] sm:$0xff]  ;;  %v181_v28 = vld [vmem:[%s987_s23 + $0x10] sm:$0xff]  ;;  %p749_p10 = scmp.lt.s32.totalorder %s1036_s4, %s747_s6  ;;  %p750_p13 = scmp.lt.s32.totalorder %s748_s7, %s742_s28 }
  0x5c   : > { %v603_v25 = vpack.c.bf16 %v210_v24, %v209_v23  ;;  %v188_v27 = vld [vmem:[%s987_s23 + $0x48] sm:$0xff]  ;;  %v189_v29 = vld [vmem:[%s987_s23 + $0x50] sm:$0xff]  ;;  %v182_v30 = vld [vmem:[%s987_s23 + $0x18] sm:$0xff]  ;;  %p745_p8 = pneg %p744_p6 }
  0x5d   : > { %582 = vmatpush3.bf16.msra.mxu0 %v579_v5  ;;  %616 = vmatpush3.bf16.msra.mxu1 %v579_v5  ;;  %v190_v31 = vld [vmem:[%s987_s23 + $0x58] sm:$0xff]  ;;  %v183_v32 = vld [vmem:[%s987_s23 + $0x20] sm:$0xff]  ;;  %v184_v34 = vld [vmem:[%s987_s23 + $0x28] sm:$0xff]  ;;  %p751_p3 = por %p750_p13, %p749_p10 }
  0x5e   : > { %584 = vmatprep.subr.bf16.mxu0 %v583_v8  ;;  %609 = vmatprep.subr.bf16.mxu1 %v583_v8  ;;  %v191_v33 = vld [vmem:[%s987_s23 + $0x60] sm:$0xff]  ;;  %v192_v35 = vld [vmem:[%s987_s23 + $0x68] sm:$0xff]  ;;  %v185_v36 = vld [vmem:[%s987_s23 + $0x30] sm:$0xff] }
  0x5f   : > { %v193_v37 = vld [vmem:[%s987_s23 + $0x70] sm:$0xff]  ;;  %v186_v38 = vld [vmem:[%s987_s23 + $0x38] sm:$0xff]  ;;  %p752_p7 = pnand %p751_p3, %p745_p8 }
  0x60   : > { %v194_v39 = vld [vmem:[%s987_s23 + $0x78] sm:$0xff] }
  0x61   : > { %586 = vmatpush3.bf16.msra.mxu0 %v583_v8  ;;  %617 = vmatpush3.bf16.msra.mxu1 %v583_v8 }
  0x62   : > { %588 = vmatprep.subr.bf16.mxu0 %v587_v13  ;;  %610 = vmatprep.subr.bf16.mxu1 %v587_v13 }
  0x65   : > { %590 = vmatpush3.bf16.msra.mxu0 %v587_v13  ;;  %618 = vmatpush3.bf16.msra.mxu1 %v587_v13 }
  0x66   : > { %592 = vmatprep.subr.bf16.mxu0 %v591_v16  ;;  %611 = vmatprep.subr.bf16.mxu1 %v591_v16 }
  0x69   : > { %594 = vmatpush3.bf16.msra.mxu0 %v591_v16  ;;  %619 = vmatpush3.bf16.msra.mxu1 %v591_v16 }
  0x6a   : > { %596 = vmatprep.subr.bf16.mxu0 %v595_v19  ;;  %612 = vmatprep.subr.bf16.mxu1 %v595_v19 }
  0x6d   : > { %598 = vmatpush3.bf16.msra.mxu0 %v595_v19  ;;  %620 = vmatpush3.bf16.msra.mxu1 %v595_v19 }
  0x6e   : > { %600 = vmatprep.subr.bf16.mxu0 %v599_v22  ;;  %613 = vmatprep.subr.bf16.mxu1 %v599_v22 }
  0x71   : > { %602 = vmatpush3.bf16.msra.mxu0 %v599_v22  ;;  %621 = vmatpush3.bf16.msra.mxu1 %v599_v22 }
  0x72   : > { %604 = vmatprep.subr.bf16.mxu0 %v603_v25  ;;  %614 = vmatprep.subr.bf16.mxu1 %v603_v25 }
  0x75   : > { %606 = vmatpush3.bf16.msra.mxu0 %v603_v25  ;;  %622 = vmatpush3.bf16.msra.mxu1 %v603_v25 }
  0x78   : > { %552 = vmatmul.mubr.f32.vlgmr.msra.gmra.mrb[0].mxu0 %v180_v26  ;;  %564 = vmatmul.mubr.f32.vlgmr.msra.gmra.mrb[0].mxu1 %v188_v27 }
  0x79   : > { %554 = vmatprep.mubr.f32.mxu0 %v181_v28  ;;  %566 = vmatprep.mubr.f32.mxu1 %v189_v29 }
  0x7c   : > { %555 = vmatmul.mubr.f32.gmra.mrb[2].mxu0 %v182_v30  ;;  %567 = vmatmul.mubr.f32.gmra.mrb[2].mxu1 %v190_v31 }
  0x7d   : > { %557 = vmatprep.mubr.f32.mxu0 %v183_v32  ;;  %569 = vmatprep.mubr.f32.mxu1 %v191_v33 }
  0x80   : > { %558 = vmatmul.mubr.f32.gmra.mrb[4].mxu0 %v184_v34  ;;  %570 = vmatmul.mubr.f32.gmra.mrb[4].mxu1 %v192_v35 }
  0x81   : > { %560 = vmatprep.mubr.f32.mxu0 %v185_v36  ;;  %572 = vmatprep.mubr.f32.mxu1 %v193_v37 }
  0x84   : > { %561 = vmatmul.mubr.f32.gmra.mrb[6].mxu0 %v186_v38  ;;  %573 = vmatmul.mubr.f32.gmra.mrb[6].mxu1 %v194_v39 }
 0x14b   : > { %v553_v40 = vpop.f32.mrb[0].mxu0  ;;  %v565_v41 = vpop.f32.mrb[0].mxu1 }
 0x14c   : > { %357 = vst [vmem:[%s1015_s15 + $0x8] sm:$0xff] %v553_v40  ;;  %365 = vst [vmem:[%s1015_s15 + $0x48] sm:$0xff] %v565_v41  ;;  %v277_v42 = vpop.f32.mrb[1].mxu0  ;;  %v317_v43 = vpop.f32.mrb[1].mxu1 }
 0x14d   : > { %356 = vst [vmem:[%s1015_s15] sm:$0xff] %v277_v42  ;;  %364 = vst [vmem:[%s1015_s15 + $0x40] sm:$0xff] %v317_v43 }
 0x14f   : > { %v556_v44 = vpop.f32.mrb[2].mxu0  ;;  %v568_v45 = vpop.f32.mrb[2].mxu1 }
 0x150   : > { %359 = vst [vmem:[%s1015_s15 + $0x18] sm:$0xff] %v556_v44  ;;  %367 = vst [vmem:[%s1015_s15 + $0x58] sm:$0xff] %v568_v45  ;;  %v287_v46 = vpop.f32.mrb[3].mxu0  ;;  %v327_v47 = vpop.f32.mrb[3].mxu1 }
 0x151   : > { %358 = vst [vmem:[%s1015_s15 + $0x10] sm:$0xff] %v287_v46  ;;  %366 = vst [vmem:[%s1015_s15 + $0x50] sm:$0xff] %v327_v47 }
 0x153   : > { %v559_v48 = vpop.f32.mrb[4].mxu0  ;;  %v571_v49 = vpop.f32.mrb[4].mxu1 }
 0x154   : > { %361 = vst [vmem:[%s1015_s15 + $0x28] sm:$0xff] %v559_v48  ;;  %369 = vst [vmem:[%s1015_s15 + $0x68] sm:$0xff] %v571_v49  ;;  %v297_v50 = vpop.f32.mrb[5].mxu0  ;;  %v337_v51 = vpop.f32.mrb[5].mxu1 }
 0x155   : > { %360 = vst [vmem:[%s1015_s15 + $0x20] sm:$0xff] %v297_v50  ;;  %368 = vst [vmem:[%s1015_s15 + $0x60] sm:$0xff] %v337_v51 }
 0x157   : > { %v562_v52 = vpop.f32.mrb[6].mxu0  ;;  %v574_v53 = vpop.f32.mrb[6].mxu1 }
 0x158   : > { %363 = vst [vmem:[%s1015_s15 + $0x38] sm:$0xff] %v562_v52  ;;  %371 = vst [vmem:[%s1015_s15 + $0x78] sm:$0xff] %v574_v53  ;;  %v307_v54 = vpop.f32.mrb[7].mxu0  ;;  %v347_v55 = vpop.f32.mrb[7].mxu1 }
 0x159   : > { %362 = vst [vmem:[%s1015_s15 + $0x30] sm:$0xff] %v307_v54  ;;  %370 = vst [vmem:[%s1015_s15 + $0x70] sm:$0xff] %v347_v55 }
 0x15a   : > { %755 = shalt.err (!%p752_p7)
}
 0x15b   : > { %s756_s20 = scalar_lea.hbm %s1034_s22, 2048  ;;  %s760_s25 = scalar_lea.hbm %s1086_s2, 4096 }
 0x15c   : > { %p757_p9 = scmp.ne.s32.totalorder %s1034_s22, %s756_s20  ;;  %p761_p5 = scmp.lt.u32.totalorder %s1034_s22, %s1086_s2 }
 0x15d   : > { %p762_p11 = scmp.lt.u32.totalorder %s760_s25, %s756_s20  ;;  %p764_p4 = scmp.lt.u32.totalorder %s756_s20, %s1034_s22 }
 0x15e   : > { %p758_p1 = pnand %p757_p9, %p930_p12 }
 0x15f   : > { %p763_p2 = por %p762_p11, %p761_p5 }
 0x160   : > { %p759_p0 = pneg %p758_p1 }
 0x161   : > { %p765_p6 = por %p764_p4, %p763_p2 }
 0x163   : > { %p766_p8 = pnand %p765_p6, %p759_p0 }
 0x165   : > { %769 = shalt.err (!%p766_p8)
}
 0x166   : > { %s819_s30 = smov 128   ;;  %s820_s23 = smov 8  }
 0x167   : > { %629 = dma.vmem_to_hbm [thread:$0]  (%p930_p12), %s1036_s4, 2048, %s1034_s22, %s373_s13, %s819_s30, %s819_s30, %s820_s23  }
 0x168 PF: > { %s401_s15 = sand.u32 1, %s800_s9   ;;  %p1101_p10 = scmp.ne.s32.totalorder %s1091_s16, 0 }
 0x169   : > { %p1102_p13 = scmp.ge.s32.totalorder %s812_s12, 2  ;;  %s402_s17 = scalar_lea.sflag [#allocation4], %s401_s15 }
 0x16b   : > { %p640_p3 = pnand %p1102_p13, %p1101_p10 }
 0x16d   : > { %795 = dma.done.wait (!%p640_p3), %s402_s17, 2048  }
 0x16e   : > { %797 = vsyncadd (!%p640_p3), %s402_s17, 4294965248  ;;  %p16_p7 = scmp.ge.s32.totalorder %s892_s21, 4   ;;  %s1103_s9 = smov %s804_s10 }
 0x16f   : > { %s1104_s10 = smov %s808_s11  ;;  %s1105_s11 = smov %s926_s8 }
 0x170   : > { %s1106_s12 = smov %s892_s21  ;;  %18 = sbr.rel (!%p16_p7) target bundleno = 6 (0x6), region = 77 }
 0x177   :  { %407 = vsyncpa [#allocation3], 1 }
 0x178   :  { %409 = vsyncpa [#allocation3 + $0x1], 1 }
 0x179   :  { %410 = vsyncpa [#allocation6], 1 }
 0x17a   :  { %411 = vsyncpa [#allocation4], 1 }
 0x17b   :  { %413 = vsyncpa [#allocation4 + $0x1], 1 }

</bundles_post_ra>
